<compile_context>
chip_gen: v7x
topology: tpu7x:2x2x1
jax: 0.10.0
libtpu: 0.0.40
codegen_flags: <defaults>
</compile_context>

<pallas_src>
import functools

import jax
import jax.numpy as jnp
from jax.experimental import pallas as pl
from jax.experimental.pallas import tpu as pltpu


def _round_up(x, m):
    return ((x + m - 1) // m) * m


def _vmem_capacity_bytes():
    """Physical VMEM per TensorCore; conservative fallback if the query fails."""
    try:
        return int(pltpu.get_tpu_info().vmem_capacity_bytes)
    except Exception:
        return 64 * 1024 * 1024  # v7x per-TC size; safe lower bound for v5e/v6e too


def prepare_decoder_params(w1, b1, w2, b2, compute_dtype=None):
    """Pad (lane-dense, multiples of 128) and cast the decoder weights ONCE.

    Call this at init and reuse the returned arrays across forwards — it removes the
    per-call HBM read+write of both weight matrices the old version paid.
    w1: (L, H), b1: (H,), w2: (H, X), b2: (X,). Biases are kept f32 (bias add + ReLU
    run in f32 in the kernel). compute_dtype=None -> bfloat16 (fast MXU path on
    v5e/v6e/v7x; accumulation stays f32). Zero padding is mathematically exact.
    """
    if compute_dtype is None:
        compute_dtype = jnp.bfloat16
    compute_dtype = jnp.dtype(compute_dtype)
    L, H = w1.shape
    X = w2.shape[1]
    Lp, Hp, Xp = (_round_up(d, 128) for d in (L, H, X))
    w1p = jnp.zeros((Lp, Hp), compute_dtype).at[:L, :H].set(w1.astype(compute_dtype))
    b1p = jnp.zeros((1, Hp), jnp.float32).at[:, :H].set(
        b1.reshape(1, -1).astype(jnp.float32))
    w2p = jnp.zeros((Hp, Xp), compute_dtype).at[:H, :X].set(w2.astype(compute_dtype))
    b2p = jnp.zeros((1, Xp), jnp.float32).at[:, :X].set(
        b2.reshape(1, -1).astype(jnp.float32))
    return w1p, b1p, w2p, b2p


def decoder_kernel(z_ref, w1_ref, b1_ref, w2_ref, b2_ref, o_ref, h_ref):
    # Hidden activation computed once per batch tile (first N tile, j == 0) into VMEM
    # scratch; later N tiles of the same batch tile reuse it (no recompute of matmul 1).
    @pl.when(pl.program_id(1) == 0)
    def _():
        h = jnp.dot(z_ref[...], w1_ref[...], preferred_element_type=jnp.float32)
        h_ref[...] = jnp.maximum(h + b1_ref[...], 0.0).astype(h_ref.dtype)

    out = jnp.dot(h_ref[...], w2_ref[...], preferred_element_type=jnp.float32)
    o_ref[...] = (out + b2_ref[...]).astype(o_ref.dtype)


def _pick_batch_tile(B, block_b):
    """Batch tile with minimal padding; >=2 grid steps (v7x megacore) when worthwhile."""
    n = max(1, -(-B // block_b))              # number of batch tiles
    tb = _round_up(-(-B // n), 8)
    if n == 1 and tb >= 16:                   # let both TensorCores take a tile
        n = 2
        tb = _round_up(-(-B // n), 8)
    return tb, tb * n


def _pick_n_tile(Xp, Hp, Lp, TB, itm, out_itm, block_n, budget):
    """Largest multiple-of-128 divisor of Xp (<= block_n) whose buffers fit `budget`."""
    resident = Lp * Hp * itm + 8 * Hp * 4                   # single-buffered w1 + b1
    fixed = resident + 2 * TB * Lp * itm + TB * Hp * itm    # z double buffer + h scratch

    def need_for(tn):
        return fixed + 2 * (Hp * tn * itm + 8 * tn * 4 + TB * tn * out_itm)

    best_tn, best_need = 128, need_for(128)
    m = Xp // 128
    for d in range(2, m + 1):
        if m % d:
            continue
        tn = 128 * d
        if tn > block_n:
            break
        need = need_for(tn)
        if need <= budget:
            best_tn, best_need = tn, need
        else:
            break  # need is monotonic in tn
    return best_tn, best_need


@functools.partial(jax.jit,
                   static_argnames=("x_dim", "block_b", "block_n", "out_dtype"))
def decoder_forward(z, w1p, b1p, w2p, b2p, *, x_dim,
                    block_b=None, block_n=1024, out_dtype=None):
    """z: (B, L); padded params from prepare_decoder_params; returns (B, x_dim)."""
    B, L = z.shape
    Lp, Hp = w1p.shape
    Xp = w2p.shape[1]
    X = x_dim
    compute_dtype = jnp.dtype(w1p.dtype)
    out_dtype = jnp.dtype(out_dtype) if out_dtype is not None else z.dtype
    itm = compute_dtype.itemsize
    out_itm = jnp.dtype(out_dtype).itemsize

    # Generation-aware budget: ~85% of physical VMEM (v7x ~54 MiB, v5e/v6e ~109 MiB).
    phys_vmem = _vmem_capacity_bytes()
    budget = int(phys_vmem * 0.85)
    if block_b is None:
        block_b = 512 if phys_vmem >= 96 * 1024 * 1024 else 256

    TB, Bp = _pick_batch_tile(B, block_b)
    TN, need = _pick_n_tile(Xp, Hp, Lp, TB, itm, out_itm, block_n, budget)

    # Request what the buffers need plus margin; stay below physical VMEM.
    margin = max(need // 4, 2 * 1024 * 1024)
    cap = budget if need <= budget else phys_vmem
    vmem_limit = int(min(need + margin, cap))

    # Pad z only when required (zero padding is exact; pads are sliced off below).
    if (Bp, Lp) == (B, L):
        zp = z if z.dtype == compute_dtype else z.astype(compute_dtype)
    else:
        zp = jnp.zeros((Bp, Lp), compute_dtype).at[:B, :L].set(
            z.astype(compute_dtype))

    # Advisory cost for the surrounding XLA scheduler (true sizes where known).
    cost = pl.CostEstimate(
        flops=2 * B * (L * Hp + Hp * X),
        transcendentals=0,
        bytes_accessed=(B * L + Lp * Hp + Hp * Xp) * itm
        + (Hp + Xp) * 4
        + B * X * out_itm,
    )

    out = pl.pallas_call(
        decoder_kernel,
        out_shape=jax.ShapeDtypeStruct((Bp, Xp), out_dtype),
        grid_spec=pltpu.PrefetchScalarGridSpec(
            num_scalar_prefetch=0,
            grid=(Bp // TB, Xp // TN),
            in_specs=[
                pl.BlockSpec((TB, Lp), lambda i, j: (i, 0)),    # z: marches over batch
                pl.BlockSpec((Lp, Hp), lambda i, j: (0, 0),
                             pipeline_mode=pl.Buffered(1)),     # w1 resident, 1-buffered
                pl.BlockSpec((1, Hp), lambda i, j: (0, 0),
                             pipeline_mode=pl.Buffered(1)),     # b1 resident, 1-buffered
                pl.BlockSpec((Hp, TN), lambda i, j: (0, j)),    # w2: streams over N tiles
                pl.BlockSpec((1, TN), lambda i, j: (0, j)),     # b2
            ],
            out_specs=pl.BlockSpec((TB, TN), lambda i, j: (i, j)),
            scratch_shapes=[pltpu.VMEM((TB, Hp), compute_dtype)],  # ReLU'd hidden tile
        ),
        compiler_params=pltpu.CompilerParams(
            dimension_semantics=("parallel", "arbitrary"),  # batch parallel; N sequential
            vmem_limit_bytes=vmem_limit,
        ),
        cost_estimate=cost,
    )(zp, w1p, b1p, w2p, b2p)

    if (Bp, Xp) != (B, X):
        out = out[:B, :X]
    return out


def init_decoder_params(key, latent_size, hidden_size, x_dim):
    """PyTorch nn.Linear default init: U[-1/sqrt(fan_in), 1/sqrt(fan_in)]."""
    k1, k2, k3, k4 = jax.random.split(key, 4)
    bound1 = 1.0 / jnp.sqrt(latent_size)
    bound2 = 1.0 / jnp.sqrt(hidden_size)
    w1 = jax.random.uniform(k1, (latent_size, hidden_size), jnp.float32, -bound1, bound1)
    b1 = jax.random.uniform(k2, (hidden_size,), jnp.float32, -bound1, bound1)
    w2 = jax.random.uniform(k3, (hidden_size, x_dim), jnp.float32, -bound2, bound2)
    b2 = jax.random.uniform(k4, (x_dim,), jnp.float32, -bound2, bound2)
    return w1, b1, w2, b2


if __name__ == "__main__":
    # Small shapes consistent with Decoder.forward: z is (batch, latent_size).
    batch, latent_size, hidden_size, x_dim = 8, 16, 32, 64

    key = jax.random.PRNGKey(0)
    k_z, k_params = jax.random.split(key)
    z = jax.random.normal(k_z, (batch, latent_size), jnp.float32)
    w1, b1, w2, b2 = init_decoder_params(k_params, latent_size, hidden_size, x_dim)

    # Reference: same math as the PyTorch module, plain JAX f32.
    ref = jnp.maximum(z @ w1 + b1, 0.0) @ w2 + b2

    # f32 path — matches the reference math tightly.
    params_f32 = prepare_decoder_params(w1, b1, w2, b2, compute_dtype=jnp.float32)
    out_f32 = jax.block_until_ready(decoder_forward(z, *params_f32, x_dim=x_dim))
    assert out_f32.shape == (batch, x_dim)
    assert jnp.allclose(out_f32, ref, atol=1e-5, rtol=1e-5)

    # Default fast path: bf16 weights AND activations, f32 accumulation/bias/ReLU.
    params_bf16 = prepare_decoder_params(w1, b1, w2, b2)
    out_bf16 = jax.block_until_ready(decoder_forward(z, *params_bf16, x_dim=x_dim))
    assert out_bf16.shape == (batch, x_dim)
    assert jnp.allclose(out_bf16, ref, atol=5e-2, rtol=5e-2)

    print("KERNEL_OK")
</pallas_src>

<mosaic_0001>
module attributes {stable_mosaic.version = 11 : i64} {
  func.func @decoder_kernel(%arg0: i32, %arg1: i32, %arg2: memref<8x128xf32, #tpu.memory_space<vmem>>, %arg3: memref<128x128xf32, #tpu.memory_space<vmem>>, %arg4: memref<1x128xf32, #tpu.memory_space<vmem>>, %arg5: memref<128x128xf32, #tpu.memory_space<vmem>>, %arg6: memref<1x128xf32, #tpu.memory_space<vmem>>, %arg7: memref<8x128xf32, #tpu.memory_space<vmem>>, %arg8: memref<8x128xf32, #tpu.memory_space<vmem>>) attributes {dimension_semantics = [#tpu.dimension_semantics<parallel>, #tpu.dimension_semantics<arbitrary>], iteration_bounds = array<i64: 1, 1>, scalar_prefetch = 0 : i64, scratch_operands = 1 : i64, tpu.core_type = #tpu.core_type<tc>, window_params = [{transform_indices = @transform_0, window_bounds = array<i64: 8, 128>}, {pipeline_mode = #tpu.pipeline_mode<synchronous>, transform_indices = @transform_1, window_bounds = array<i64: 128, 128>}, {pipeline_mode = #tpu.pipeline_mode<synchronous>, transform_indices = @transform_2, window_bounds = array<i64: 1, 128>}, {transform_indices = @transform_3, window_bounds = array<i64: 128, 128>}, {transform_indices = @transform_4, window_bounds = array<i64: 1, 128>}, {transform_indices = @transform_5, window_bounds = array<i64: 8, 128>}]} {
    %c0_i32 = arith.constant 0 : i32
    %0 = arith.cmpi eq, %arg1, %c0_i32 : i32
    %1 = arith.extui %0 : i1 to i32
    %c0_i32_0 = arith.constant 0 : i32
    %2 = arith.cmpi ne, %1, %c0_i32_0 : i32
    scf.if %2 {
      %c0_8 = arith.constant 0 : index
      %c0_9 = arith.constant 0 : index
      %10 = vector.load %arg2[%c0_8, %c0_9] : memref<8x128xf32, #tpu.memory_space<vmem>>, vector<8x128xf32>
      %c0_10 = arith.constant 0 : index
      %c0_11 = arith.constant 0 : index
      %11 = vector.load %arg3[%c0_10, %c0_11] : memref<128x128xf32, #tpu.memory_space<vmem>>, vector<128x128xf32>
      %cst_12 = arith.constant dense<0.000000e+00> : vector<8x128xf32>
      %12 = tpu.matmul %10, %11, %cst_12 {dimension_numbers = #tpu.dot_dimension_numbers<[1], [0], [0], [1], [0, 0, 1, 1], [], []>} : vector<8x128xf32>, vector<128x128xf32>, vector<8x128xf32> -> vector<8x128xf32>
      %c0_13 = arith.constant 0 : index
      %c0_14 = arith.constant 0 : index
      %13 = vector.load %arg4[%c0_13, %c0_14] : memref<1x128xf32, #tpu.memory_space<vmem>>, vector<1x128xf32>
      %14 = vector.broadcast %13 : vector<1x128xf32> to vector<8x128xf32>
      %15 = arith.addf %12, %14 : vector<8x128xf32>
      %cst_15 = arith.constant 0.000000e+00 : f32
      %16 = vector.broadcast %cst_15 : f32 to vector<8x128xf32>
      %17 = arith.maximumf %15, %16 : vector<8x128xf32>
      %c0_16 = arith.constant 0 : index
      %c0_17 = arith.constant 0 : index
      %18 = vector.load %arg8[%c0_16, %c0_17] : memref<8x128xf32, #tpu.memory_space<vmem>>, vector<8x128xf32>
      tpu.vector_store %arg8[%c0_16, %c0_17], %17 {strides = array<i32>} : memref<8x128xf32, #tpu.memory_space<vmem>>, vector<8x128xf32>,
    } else {
    }
    %c0 = arith.constant 0 : index
    %c0_1 = arith.constant 0 : index
    %3 = vector.load %arg8[%c0, %c0_1] : memref<8x128xf32, #tpu.memory_space<vmem>>, vector<8x128xf32>
    %c0_2 = arith.constant 0 : index
    %c0_3 = arith.constant 0 : index
    %4 = vector.load %arg5[%c0_2, %c0_3] : memref<128x128xf32, #tpu.memory_space<vmem>>, vector<128x128xf32>
    %cst = arith.constant dense<0.000000e+00> : vector<8x128xf32>
    %5 = tpu.matmul %3, %4, %cst {dimension_numbers = #tpu.dot_dimension_numbers<[1], [0], [0], [1], [0, 0, 1, 1], [], []>} : vector<8x128xf32>, vector<128x128xf32>, vector<8x128xf32> -> vector<8x128xf32>
    %c0_4 = arith.constant 0 : index
    %c0_5 = arith.constant 0 : index
    %6 = vector.load %arg6[%c0_4, %c0_5] : memref<1x128xf32, #tpu.memory_space<vmem>>, vector<1x128xf32>
    %7 = vector.broadcast %6 : vector<1x128xf32> to vector<8x128xf32>
    %8 = arith.addf %5, %7 : vector<8x128xf32>
    %c0_6 = arith.constant 0 : index
    %c0_7 = arith.constant 0 : index
    %9 = vector.load %arg7[%c0_6, %c0_7] : memref<8x128xf32, #tpu.memory_space<vmem>>, vector<8x128xf32>
    tpu.vector_store %arg7[%c0_6, %c0_7], %8 {strides = array<i32>} : memref<8x128xf32, #tpu.memory_space<vmem>>, vector<8x128xf32>,
    return
  }
  func.func @transform_0(%arg0: i32, %arg1: i32) -> (i32, i32) {
    %c0_i32 = arith.constant 0 : i32
    %c0_i32_0 = arith.constant 0 : i32
    return %arg0, %c0_i32 : i32, i32
  }
  func.func @transform_1(%arg0: i32, %arg1: i32) -> (i32, i32) {
    %c0_i32 = arith.constant 0 : i32
    %c0_i32_0 = arith.constant 0 : i32
    %c0_i32_1 = arith.constant 0 : i32
    return %c0_i32, %c0_i32_0 : i32, i32
  }
  func.func @transform_2(%arg0: i32, %arg1: i32) -> (i32, i32) {
    %c0_i32 = arith.constant 0 : i32
    %c0_i32_0 = arith.constant 0 : i32
    %c0_i32_1 = arith.constant 0 : i32
    return %c0_i32, %c0_i32_0 : i32, i32
  }
  func.func @transform_3(%arg0: i32, %arg1: i32) -> (i32, i32) {
    %c0_i32 = arith.constant 0 : i32
    %c0_i32_0 = arith.constant 0 : i32
    return %c0_i32, %arg1 : i32, i32
  }
  func.func @transform_4(%arg0: i32, %arg1: i32) -> (i32, i32) {
    %c0_i32 = arith.constant 0 : i32
    %c0_i32_0 = arith.constant 0 : i32
    return %c0_i32, %arg1 : i32, i32
  }
  func.func @transform_5(%arg0: i32, %arg1: i32) -> (i32, i32) {
    %c0_i32 = arith.constant 0 : i32
    return %arg0, %arg1 : i32, i32
  }
}

</mosaic_0001>

<bundles_post_ra>
// kernel: decoder_forward.1
= control target key start
LH: loop header
LB: loop body
LE: loop exit
PB: predicated region body
PF: predicated region fallthrough
CT: control target
= control target key end

     0   :  { %10 = vsyncpa [#allocation4], 0  ;;  %s593_s0 = inlined_call_operand.vmem [shape: f32[8,128], index: 0, kind: input, shape index: {}]   ;;  %s594_s1 = inlined_call_operand.hbm [shape: f32[128,128], index: 1, kind: input, shape index: {}]   ;;  %s595_s2 = inlined_call_operand.vmem [shape: f32[1,128], index: 2, kind: input, shape index: {}]   ;;  %s596_s3 = inlined_call_operand.hbm [shape: f32[128,128], index: 3, kind: input, shape index: {}]   ;;  %s597_s4 = inlined_call_operand.vmem [shape: f32[1,128], index: 4, kind: input, shape index: {}]   ;;  %s598_s5 = inlined_call_operand.hbm [shape: f32[8,128], index: 5, kind: output, shape index: {}]  }
   0x1   :  { %11 = vsyncpa [#allocation7], 0 }
   0x2   :  { %12 = vsyncpa [#allocation5], 0  ;;  %s494_s18 = smov [#allocation3]   ;;  %s422_s22 = scalar_lea.hbm %s594_s1, 2048 }
   0x3   :  { %s20_s19 = sshll.u32 %s494_s18, 4  ;;  %p423_p0 = scmp.ne.s32.totalorder %s594_s1, %s422_s22  ;;  %s21_s19 = int_to_ptr.vmem [resolvable:$true] %s20_s19 }
   0x4   :  { %p426_p1 = scmp.lt.u32.totalorder %s422_s22, %s594_s1 }
   0x6   :  { %p428_p2 = pnand %p426_p1, %p423_p0 }
   0x8   :  { %431 = shalt.err (!%p428_p2)
}
   0x9   :  { %s432_s27 = scalar_lea.vmem %s21_s19, 2048  ;;  %p437_p4 = scmp.lt.s32.totalorder %s21_s19, %s21_s19 }
   0xa   :  { %p433_p3 = scmp.ne.s32.totalorder %s21_s19, %s432_s27  ;;  %p438_p5 = scmp.lt.s32.totalorder %s432_s27, %s432_s27 }
   0xc   :  { %p439_p6 = por %p438_p5, %p437_p4 }
   0xe   :  { %p440_p7 = pnand %p439_p6, %p433_p3 }
  0x10   :  { %443 = shalt.err (!%p440_p7)
}
  0x11   :  { %s495_s28 = smov 128   ;;  %s496_s29 = smov 8  }
  0x12   :  { %26 = dma.hbm_to_vmem [thread:$0]  %s594_s1, 2048, %s21_s19, [#allocation4], %s495_s28, %s495_s28, %s496_s29  }
  0x13   :  { %s497_s7 = smov [#allocation6]   ;;  %s444_s11 = scalar_lea.hbm %s596_s3, 2048 }
  0x14   :  { %s34_s8 = sshll.u32 %s497_s7, 4  ;;  %p445_p8 = scmp.ne.s32.totalorder %s596_s3, %s444_s11  ;;  %s35_s8 = int_to_ptr.vmem [resolvable:$true] %s34_s8 }
  0x15   :  { %p448_p9 = scmp.lt.u32.totalorder %s444_s11, %s596_s3 }
  0x17   :  { %p450_p10 = pnand %p448_p9, %p445_p8 }
  0x19   :  { %453 = shalt.err (!%p450_p10)
}
  0x1a   :  { %s454_s16 = scalar_lea.vmem %s35_s8, 2048  ;;  %p459_p12 = scmp.lt.s32.totalorder %s35_s8, %s35_s8 }
  0x1b   :  { %p455_p11 = scmp.ne.s32.totalorder %s35_s8, %s454_s16  ;;  %p460_p13 = scmp.lt.s32.totalorder %s454_s16, %s454_s16 }
  0x1d   :  { %p461_p0 = por %p460_p13, %p459_p12 }
  0x1f   :  { %p462_p1 = pnand %p461_p0, %p455_p11 }
  0x21   :  { %465 = shalt.err (!%p462_p1)
}
  0x22   :  { %40 = dma.hbm_to_vmem [thread:$0]  %s596_s3, 2048, %s35_s8, [#allocation7], %s495_s28, %s495_s28, %s496_s29  }
  0x23   :  { %488 = dma.done.wait [#allocation4], 2048  }
  0x24   :  { %489 = vsyncadd [#allocation4], 4294965248 }
  0x25   :  { %490 = dma.done.wait [#allocation7], 2048  }
  0x26   :  { %491 = vsyncadd [#allocation7], 4294965248  ;;  %v498_v0 = vmov 0.0|0.0   ;;  %vm499_vm0 = vmmov 0   ;;  %v500_v1 = vmov 0.0   ;;  %v54_v2 = vld [vmem:[#allocation3] sm:$0xff] }
  0x27   :  { %366 = vmatprep.subr.bf16.mxu0 %v498_v0  ;;  %328 = vmatprep.mubr.msk.f32.mxu0 %vm499_vm0, %v500_v1  ;;  %v55_v3 = vld [vmem:[#allocation3 + $0x8] sm:$0xff]  ;;  %v56_v4 = vld [vmem:[#allocation3 + $0x10] sm:$0xff]  ;;  %v57_v6 = vld [vmem:[#allocation3 + $0x18] sm:$0xff] }
  0x28   :  { %390 = vmatprep.subr.bf16.mxu1 %v498_v0  ;;  %363 = vmatprep.mubr.msk.f32.mxu1 %vm499_vm0, %v500_v1  ;;  %v367_v5 = vpack.c.bf16 %v55_v3, %v54_v2  ;;  %v370_v7 = vpack.c.bf16 %v57_v6, %v56_v4  ;;  %v58_v8 = vld [vmem:[#allocation3 + $0x20] sm:$0xff]  ;;  %v59_v9 = vld [vmem:[#allocation3 + $0x28] sm:$0xff]  ;;  %v152_v12 = vld [vmem:[#allocation6 + $0x10] sm:$0xff] }
  0x29   :  { %v150_v10 = vld [vmem:[#allocation6] sm:$0xff]  ;;  %v151_v11 = vld [vmem:[#allocation6 + $0x8] sm:$0xff]  ;;  %v153_v13 = vld [vmem:[#allocation6 + $0x18] sm:$0xff]  ;;  %v373_v14 = vpack.c.bf16 %v59_v9, %v58_v8 }
  0x2a   :  { %368 = vmatpush3.bf16.msra.mxu0 %v367_v5  ;;  %v391_v15 = vpack.c.bf16 %v151_v11, %v150_v10  ;;  %v60_v16 = vld [vmem:[#allocation3 + $0x30] sm:$0xff]  ;;  %v61_v17 = vld [vmem:[#allocation3 + $0x38] sm:$0xff]  ;;  %v394_v18 = vpack.c.bf16 %v153_v13, %v152_v12  ;;  %v154_v19 = vld [vmem:[#allocation6 + $0x20] sm:$0xff] }
  0x2b   :  { %369 = vmatprep.subr.bf16.mxu0 %v498_v0  ;;  %v155_v20 = vld [vmem:[#allocation6 + $0x28] sm:$0xff]  ;;  %v376_v21 = vpack.c.bf16 %v61_v17, %v60_v16  ;;  %v62_v22 = vld [vmem:[#allocation3 + $0x40] sm:$0xff]  ;;  %v156_v25 = vld [vmem:[#allocation6 + $0x30] sm:$0xff] }
  0x2c   :  { %392 = vmatpush3.bf16.msra.mxu1 %v391_v15  ;;  %v63_v23 = vld [vmem:[#allocation3 + $0x48] sm:$0xff]  ;;  %v397_v24 = vpack.c.bf16 %v155_v20, %v154_v19  ;;  %v157_v26 = vld [vmem:[#allocation6 + $0x38] sm:$0xff]  ;;  %v64_v28 = vld [vmem:[#allocation3 + $0x50] sm:$0xff] }
  0x2d   :  { %393 = vmatprep.subr.bf16.mxu1 %v498_v0  ;;  %v379_v27 = vpack.c.bf16 %v63_v23, %v62_v22  ;;  %v65_v29 = vld [vmem:[#allocation3 + $0x58] sm:$0xff]  ;;  %v400_v30 = vpack.c.bf16 %v157_v26, %v156_v25  ;;  %v158_v31 = vld [vmem:[#allocation6 + $0x40] sm:$0xff]  ;;  %v159_v32 = vld [vmem:[#allocation6 + $0x48] sm:$0xff] }
  0x2e   :  { %371 = vmatpush3.bf16.msra.mxu0 %v370_v7  ;;  %v382_v33 = vpack.c.bf16 %v65_v29, %v64_v28  ;;  %v66_v34 = vld [vmem:[#allocation3 + $0x60] sm:$0xff]  ;;  %v67_v35 = vld [vmem:[#allocation3 + $0x68] sm:$0xff]  ;;  %v403_v36 = vpack.c.bf16 %v159_v32, %v158_v31  ;;  %v160_v37 = vld [vmem:[#allocation6 + $0x50] sm:$0xff] }
  0x2f   :  { %372 = vmatprep.subr.bf16.mxu0 %v498_v0  ;;  %v161_v38 = vld [vmem:[#allocation6 + $0x58] sm:$0xff]  ;;  %v385_v39 = vpack.c.bf16 %v67_v35, %v66_v34  ;;  %v68_v40 = vld [vmem:[#allocation3 + $0x70] sm:$0xff]  ;;  %v162_v43 = vld [vmem:[#allocation6 + $0x60] sm:$0xff] }
  0x30   :  { %395 = vmatpush3.bf16.msra.mxu1 %v394_v18  ;;  %v69_v41 = vld [vmem:[#allocation3 + $0x78] sm:$0xff]  ;;  %v406_v42 = vpack.c.bf16 %v161_v38, %v160_v37  ;;  %v163_v44 = vld [vmem:[#allocation6 + $0x68] sm:$0xff]  ;;  %v53_v47 = vld [vmem:[%s593_s0] sm:$0xff]  ;;  %s501_s0 = smov [#allocation8]  }
  0x31   :  { %396 = vmatprep.subr.bf16.mxu1 %v498_v0  ;;  %v388_v45 = vpack.c.bf16 %v69_v41, %v68_v40  ;;  %v409_v46 = vpack.c.bf16 %v163_v44, %v162_v43  ;;  %v164_v48 = vld [vmem:[#allocation6 + $0x70] sm:$0xff]  ;;  %v165_v49 = vld [vmem:[#allocation6 + $0x78] sm:$0xff]  ;;  %v260_v51 = vld [vmem:[%s595_s2] ss:$0 sm:$0xff]  ;;  %s250_s23 = sshll.u32 %s501_s0, 4  ;;  %s251_s23 = int_to_ptr.vmem [resolvable:$true] %s250_s23 }
  0x32   :  { %374 = vmatpush3.bf16.msra.mxu0 %v373_v14  ;;  %v412_v50 = vpack.c.bf16 %v165_v49, %v164_v48  ;;  %v261_v56 = vld [vmem:[%s597_s4] ss:$0 sm:$0xff]  ;;  %s466_s24 = scalar_lea.vmem %s251_s23, 128  ;;  %p471_p3 = scmp.lt.s32.totalorder %s251_s23, %s251_s23 }
  0x33   :  { %375 = vmatprep.subr.bf16.mxu0 %v498_v0  ;;  %p467_p2 = scmp.ne.s32.totalorder %s251_s23, %s466_s24  ;;  %p472_p4 = scmp.lt.s32.totalorder %s466_s24, %s466_s24 }
  0x34   :  { %398 = vmatpush3.bf16.msra.mxu1 %v397_v24 }
  0x35   :  { %399 = vmatprep.subr.bf16.mxu1 %v498_v0  ;;  %p473_p5 = por %p472_p4, %p471_p3 }
  0x36   :  { %377 = vmatpush3.bf16.msra.mxu0 %v376_v21 }
  0x37   :  { %378 = vmatprep.subr.bf16.mxu0 %v498_v0  ;;  %p474_p6 = pnand %p473_p5, %p467_p2 }
  0x38   :  { %401 = vmatpush3.bf16.msra.mxu1 %v400_v30 }
  0x39   :  { %402 = vmatprep.subr.bf16.mxu1 %v498_v0 }
  0x3a   :  { %380 = vmatpush3.bf16.msra.mxu0 %v379_v27 }
  0x3b   :  { %381 = vmatprep.subr.bf16.mxu0 %v498_v0 }
  0x3c   :  { %404 = vmatpush3.bf16.msra.mxu1 %v403_v36 }
  0x3d   :  { %405 = vmatprep.subr.bf16.mxu1 %v498_v0 }
  0x3e   :  { %383 = vmatpush3.bf16.msra.mxu0 %v382_v33 }
  0x3f   :  { %384 = vmatprep.subr.bf16.mxu0 %v498_v0 }
  0x40   :  { %407 = vmatpush3.bf16.msra.mxu1 %v406_v42 }
  0x41   :  { %408 = vmatprep.subr.bf16.mxu1 %v498_v0 }
  0x42   :  { %386 = vmatpush3.bf16.msra.mxu0 %v385_v39 }
  0x43   :  { %387 = vmatprep.subr.bf16.mxu0 %v498_v0 }
  0x44   :  { %410 = vmatpush3.bf16.msra.mxu1 %v409_v46 }
  0x45   :  { %411 = vmatprep.subr.bf16.mxu1 %v498_v0 }
  0x46   :  { %389 = vmatpush3.bf16.msra.mxu0 %v388_v45 }
  0x48   :  { %413 = vmatpush3.bf16.msra.mxu1 %v412_v50 }
  0x49   :  { %329 = vmatmul.mubr.f32.vlgmr.msra.gmra.mrb[0].mxu0 %v53_v47 }
 0x11c   :  { %v143_v52 = vpop.f32.mrb[0].mxu0 }
 0x11d   :  { %v144_v53 = vadd.f32 %v260_v51, %v143_v52  ;;  %v330_v54 = vpop.f32.mrb[1].mxu0 }
 0x11f   :  { %v147_v55 = vmax.f32 %v144_v53, 0.0 }
 0x121   :  { %364 = vmatmul.mubr.f32.vlgmr.msra.gmra.mrb[0].mxu1 %v147_v55 }
 0x1f4   :  { %v239_v57 = vpop.f32.mrb[0].mxu1 }
 0x1f5   :  { %v240_v58 = vadd.f32 %v261_v56, %v239_v57  ;;  %v365_v59 = vpop.f32.mrb[1].mxu1 }
 0x1f7   :  { %243 = vst [vmem:[#allocation8] sm:$0xff] %v240_v58 }
 0x1f8   :  { %477 = shalt.err (!%p474_p6)
}
 0x1f9   :  { %s478_s26 = scalar_lea.hbm %s598_s5, 128 }
 0x1fa   :  { %p479_p7 = scmp.ne.s32.totalorder %s598_s5, %s478_s26  ;;  %p482_p8 = scmp.lt.u32.totalorder %s478_s26, %s598_s5 }
 0x1fc   :  { %p484_p9 = pnand %p482_p8, %p479_p7 }
 0x1fe   :  { %487 = shalt.err (!%p484_p9)
}
 0x1ff   :  { %253 = dma.vmem_to_hbm [thread:$0]  %s251_s23, 128, %s598_s5, [#allocation5]  }
 0x200   :  { %492 = dma.done.wait [#allocation5], 128  }
 0x201   :  { %493 = vsyncadd [#allocation5], 4294967168 }
 0x202   :  { %257 = vsyncpa [#allocation4], 1 }
 0x203   :  { %258 = vsyncpa [#allocation7], 1 }
 0x204   :  { %259 = vsyncpa [#allocation5], 1 }

</bundles_post_ra>
